<compile_context>
chip_gen: v6e
topology: v6e:2x2x1
jax: 0.10.0
libtpu: 0.0.40
codegen_flags: <defaults>
</compile_context>

<pallas_src>
import jax
import jax.numpy as jnp
from jax import lax
from jax.experimental import pallas as pl
from jax.experimental.pallas import tpu as pltpu

BN_EPS = 1e-5
LANE = 128


# ----------------------------------------------------------------------------
# helpers
# ----------------------------------------------------------------------------
def _round_up(x, m):
    return ((x + m - 1) // m) * m


def _pad2(a, rows, cols):
    return jnp.pad(a, ((0, rows - a.shape[0]), (0, cols - a.shape[1])))


def _choose_tiles(n):
    """Pick (n_pad, tm, tk) with tm | n_pad and tk | n_pad.

    Large tiles (up to 1024 x 4096) amortize the ~0.35us per-grid-step
    overhead; a candidate is only taken if it pads the node axis by <=12.5%.
    """
    n_pad = _round_up(max(n, 128), 128)
    tm = 128
    for cand in (1024, 512, 256):
        if cand <= n_pad and (_round_up(n_pad, cand) - n_pad) * 8 <= n_pad:
            tm = cand
            break
    n_pad = _round_up(n_pad, tm)
    tk = 128
    for cand in (4096, 2048, 1024, 512, 256):
        if cand <= n_pad and n_pad % cand == 0:
            tk = cand
            break
    return n_pad, tm, tk


def _vmem_ceiling_bytes():
    """~75% of physical per-core VMEM (48 MiB on v7x, 96 MiB on v5e/v6e)."""
    try:
        cap = pltpu.get_tpu_info().vmem_capacity_bytes
    except Exception:
        cap = 64 << 20          # conservative fallback, safe on every chip
    return int(cap * 3) // 4


def _prop_vmem_plan(n_pad, tm, tk, g_pad, fp):
    """Decide whether Y can stay resident and compute a vmem_limit request."""
    ceiling = _vmem_ceiling_bytes()

    def need(resident):
        b = 2 * tm * tk * 2                                   # A tiles (bf16, x2)
        b += (2 * n_pad * fp * 2) if resident else (2 * tk * fp * 2)   # Y
        b += tm * fp * 4                                      # f32 accumulator
        b += 2 * tm * fp * 2                                  # Y2 output tiles
        b += 2 * g_pad * tm * 2                               # pool tiles (layer 2)
        b += 2 * g_pad * fp * 4                               # pooled partial out
        b += 2 * fp * fp * 2 + 4 * fp * 4                     # resident W2 + biases
        return b

    resident = need(True) + (2 << 20) <= ceiling
    limit = int(min(max(need(resident) * 3 // 2, 16 << 20), ceiling))
    return resident, limit


# ----------------------------------------------------------------------------
# kernel 1: Y1 = X @ W1'   (row-tiled feature transform, kept out of A loop)
# ----------------------------------------------------------------------------
def _xw_kernel(x_ref, w_ref, y_ref):
    y_ref[...] = jnp.dot(x_ref[...], w_ref[...],
                         preferred_element_type=jnp.float32).astype(y_ref.dtype)


def _dense_xw(x, w, tm):
    n_pad, f_in = x.shape
    f_out = w.shape[1]
    return pl.pallas_call(
        _xw_kernel,
        out_shape=jax.ShapeDtypeStruct((n_pad, f_out), jnp.bfloat16),
        grid_spec=pltpu.PrefetchScalarGridSpec(
            num_scalar_prefetch=0,
            grid=(n_pad // tm,),
            in_specs=[pl.BlockSpec((tm, f_in), lambda i: (i, 0)),
                      pl.BlockSpec((f_in, f_out), lambda i: (0, 0))],
            out_specs=pl.BlockSpec((tm, f_out), lambda i: (i, 0)),
        ),
        compiler_params=pltpu.CompilerParams(
            dimension_semantics=("parallel",)),
    )(x, w)


# ----------------------------------------------------------------------------
# kernel 2: layer-1 propagate, fused with the layer-2 feature transform:
#   acc += A[i,k] @ Y1[k];  epilogue:  Y2[i] = relu(acc + b1') @ W2'
# ----------------------------------------------------------------------------
def _make_prop1_kernel(tk, y_resident):
    def kernel(a_ref, y_ref, b1_ref, w2_ref, y2_ref, acc_ref):
        k = pl.program_id(1)

        @pl.when(k == 0)
        def _():
            acc_ref[...] = jnp.zeros_like(acc_ref)

        if y_resident:
            start = pl.multiple_of(k * tk, tk)
            y_blk = y_ref[pl.ds(start, tk), :]
        else:
            y_blk = y_ref[...]
        acc_ref[...] += jnp.dot(a_ref[...], y_blk,
                                preferred_element_type=jnp.float32)

        @pl.when(k == pl.num_programs(1) - 1)
        def _():
            h1 = jnp.maximum(acc_ref[...] + b1_ref[...], 0.0)
            y2_ref[...] = jnp.dot(h1.astype(jnp.bfloat16), w2_ref[...],
                                  preferred_element_type=jnp.float32
                                  ).astype(y2_ref.dtype)
    return kernel


def _propagate1(a, y1, b1, w2, tm, tk, y_resident, vmem_limit):
    n_pad = a.shape[0]
    h1 = y1.shape[1]
    h2 = w2.shape[1]
    if y_resident:
        y_spec = pl.BlockSpec((n_pad, h1), lambda i, k: (0, 0))   # resident in VMEM
    else:
        y_spec = pl.BlockSpec((tk, h1), lambda i, k: (k, 0))      # K-streamed
    return pl.pallas_call(
        _make_prop1_kernel(tk, y_resident),
        out_shape=jax.ShapeDtypeStruct((n_pad, h2), jnp.bfloat16),
        grid_spec=pltpu.PrefetchScalarGridSpec(
            num_scalar_prefetch=0,
            grid=(n_pad // tm, n_pad // tk),
            in_specs=[pl.BlockSpec((tm, tk), lambda i, k: (i, k)),
                      y_spec,
                      pl.BlockSpec((1, h1), lambda i, k: (0, 0)),
                      pl.BlockSpec((h1, h2), lambda i, k: (0, 0))],
            out_specs=pl.BlockSpec((tm, h2), lambda i, k: (i, 0)),
            scratch_shapes=[pltpu.VMEM((tm, h1), jnp.float32)]),
        compiler_params=pltpu.CompilerParams(
            dimension_semantics=("parallel", "arbitrary"),
            vmem_limit_bytes=vmem_limit),
    )(a, y1, b1, w2)


# ----------------------------------------------------------------------------
# kernel 3: layer-2 propagate, fused with mean-pool partials:
#   acc += A[i,k] @ Y2[k];  epilogue: part[i] = P[:, i-tile] @ relu(acc + b2')
# ----------------------------------------------------------------------------
def _make_prop2_kernel(tk, y_resident):
    def kernel(a_ref, y_ref, b2_ref, pool_ref, part_ref, acc_ref):
        k = pl.program_id(1)

        @pl.when(k == 0)
        def _():
            acc_ref[...] = jnp.zeros_like(acc_ref)

        if y_resident:
            start = pl.multiple_of(k * tk, tk)
            y_blk = y_ref[pl.ds(start, tk), :]
        else:
            y_blk = y_ref[...]
        acc_ref[...] += jnp.dot(a_ref[...], y_blk,
                                preferred_element_type=jnp.float32)

        @pl.when(k == pl.num_programs(1) - 1)
        def _():
            h2 = jnp.maximum(acc_ref[...] + b2_ref[...], 0.0)
            part_ref[0] = jnp.dot(pool_ref[...], h2.astype(jnp.bfloat16),
                                  preferred_element_type=jnp.float32)
    return kernel


def _propagate2_pool(a, y2, b2, pool, tm, tk, y_resident, vmem_limit):
    n_pad = a.shape[0]
    h2 = y2.shape[1]
    g_pad = pool.shape[0]
    n_row_tiles = n_pad // tm
    if y_resident:
        y_spec = pl.BlockSpec((n_pad, h2), lambda i, k: (0, 0))
    else:
        y_spec = pl.BlockSpec((tk, h2), lambda i, k: (k, 0))
    return pl.pallas_call(
        _make_prop2_kernel(tk, y_resident),
        out_shape=jax.ShapeDtypeStruct((n_row_tiles, g_pad, h2), jnp.float32),
        grid_spec=pltpu.PrefetchScalarGridSpec(
            num_scalar_prefetch=0,
            grid=(n_row_tiles, n_pad // tk),
            in_specs=[pl.BlockSpec((tm, tk), lambda i, k: (i, k)),
                      y_spec,
                      pl.BlockSpec((1, h2), lambda i, k: (0, 0)),
                      pl.BlockSpec((g_pad, tm), lambda i, k: (0, i))],
            out_specs=pl.BlockSpec((1, g_pad, h2), lambda i, k: (i, 0, 0)),
            scratch_shapes=[pltpu.VMEM((tm, h2), jnp.float32)]),
        compiler_params=pltpu.CompilerParams(
            dimension_semantics=("parallel", "arbitrary"),
            vmem_limit_bytes=vmem_limit),
    )(a, y2, b2, pool)


# ----------------------------------------------------------------------------
# forward
# ----------------------------------------------------------------------------
def gcn_forward(x, edge_index, batch, params, num_graphs):
    """x: [N, F] f32, edge_index: [2, E] i32, batch: [N] i32."""
    n, f_in = x.shape
    h1_dim = params["w1"].shape[1]
    h2_dim = params["w2"].shape[1]

    # --- pad to TPU-friendly shapes ---
    n_pad, tm, tk = _choose_tiles(n)
    f_in_pad = _round_up(f_in, LANE)
    h1_pad = _round_up(h1_dim, LANE)
    h2_pad = _round_up(h2_dim, LANE)
    g_pad = _round_up(num_graphs, 16)          # bf16 sublane packing is 16-deep

    # --- glue: normalized adjacency D^{-1/2}(A+I)D^{-1/2}, built directly as a
    #     padded bf16 value-scatter (no intermediate f32 N x N pass) ---
    loops = jnp.arange(n, dtype=edge_index.dtype)
    rows = jnp.concatenate([edge_index[0], loops])
    cols = jnp.concatenate([edge_index[1], loops])
    deg = jnp.zeros((n,), jnp.float32).at[rows].add(1.0)
    dinv = jnp.where(deg > 0, lax.rsqrt(deg), 0.0)
    vals = (dinv[rows] * dinv[cols]).astype(jnp.bfloat16)
    a_p = jnp.zeros((n_pad, n_pad), jnp.bfloat16).at[rows, cols].set(vals)

    # --- glue: mean-pool operator P[g, i] = 1/|graph g| ---
    onehot = (batch[None, :] ==
              jnp.arange(num_graphs, dtype=batch.dtype)[:, None]).astype(jnp.float32)
    counts = jnp.maximum(jnp.sum(onehot, axis=1, keepdims=True), 1.0)
    pool_p = _pad2(onehot / counts, g_pad, n_pad).astype(jnp.bfloat16)

    # --- fold eval-mode BatchNorm into conv weights / biases ---
    s1 = params["g1"] / jnp.sqrt(params["v1"] + BN_EPS)
    w1f = params["w1"] * s1
    b1f = (params["b1"] - params["m1"]) * s1 + params["be1"]
    s2 = params["g2"] / jnp.sqrt(params["v2"] + BN_EPS)
    w2f = params["w2"] * s2
    b2f = (params["b2"] - params["m2"]) * s2 + params["be2"]

    x_p = _pad2(x, n_pad, f_in_pad).astype(jnp.bfloat16)
    w1_p = _pad2(w1f, f_in_pad, h1_pad).astype(jnp.bfloat16)
    b1_p = _pad2(b1f, 1, h1_pad)
    w2_p = _pad2(w2f, h1_pad, h2_pad).astype(jnp.bfloat16)
    b2_p = _pad2(b2f, 1, h2_pad)

    # --- VMEM budget: resident-Y if it fits (with headroom), else K-stream ---
    y_resident, vmem_limit = _prop_vmem_plan(n_pad, tm, tk, g_pad, LANE)

    # --- Pallas pipeline ---
    y1 = _dense_xw(x_p, w1_p, tm)                           # X @ W1'
    y2 = _propagate1(a_p, y1, b1_p, w2_p, tm, tk,           # relu(A@Y1+b1') @ W2'
                     y_resident, vmem_limit)
    partials = _propagate2_pool(a_p, y2, b2_p, pool_p, tm, tk,   # P @ relu(A@Y2+b2')
                                y_resident, vmem_limit)

    # --- tiny head in XLA (per review: (G,32)@(32,C) severely underfills MXU) ---
    pooled = jnp.sum(partials, axis=0)[:num_graphs, :h2_dim]     # f32
    logits = pooled @ params["wl"] + params["bl"]
    return jax.nn.log_softmax(logits, axis=1)


# ----------------------------------------------------------------------------
# params
# ----------------------------------------------------------------------------
def init_params(key, num_node_features, num_classes):
    h1, h2 = 64, 32
    ks = jax.random.split(key, 8)

    def u(k, shape, scale):
        return jax.random.uniform(k, shape, jnp.float32, -scale, scale)

    return {
        "w1": u(ks[0], (num_node_features, h1), 1.0 / jnp.sqrt(num_node_features)),
        "b1": jnp.zeros((1, h1), jnp.float32),
        "g1": jnp.ones((1, h1), jnp.float32),
        "be1": jnp.zeros((1, h1), jnp.float32),
        "m1": 0.1 * jax.random.normal(ks[1], (1, h1), jnp.float32),
        "v1": jnp.ones((1, h1), jnp.float32) + 0.1 * jax.random.uniform(ks[2], (1, h1)),
        "w2": u(ks[3], (h1, h2), 1.0 / jnp.sqrt(h1)),
        "b2": jnp.zeros((1, h2), jnp.float32),
        "g2": jnp.ones((1, h2), jnp.float32),
        "be2": jnp.zeros((1, h2), jnp.float32),
        "m2": 0.1 * jax.random.normal(ks[4], (1, h2), jnp.float32),
        "v2": jnp.ones((1, h2), jnp.float32) + 0.1 * jax.random.uniform(ks[5], (1, h2)),
        "wl": u(ks[6], (h2, num_classes), 1.0 / jnp.sqrt(h2)),
        "bl": u(ks[7], (1, num_classes), 1.0 / jnp.sqrt(h2)),
    }


if __name__ == "__main__":
    key = jax.random.PRNGKey(0)
    num_node_features = 8
    num_classes = 4
    num_nodes = 16
    num_graphs = 2

    k_x, k_p = jax.random.split(key)
    x = jax.random.normal(k_x, (num_nodes, num_node_features), jnp.float32)

    # Two ring graphs of 8 nodes each (undirected edges listed both ways).
    src, dst = [], []
    for g in range(num_graphs):
        base = g * 8
        for i in range(8):
            a_node = base + i
            b_node = base + (i + 1) % 8
            src += [a_node, b_node]
            dst += [b_node, a_node]
    edge_index = jnp.array([src, dst], dtype=jnp.int32)       # [2, E]
    batch = jnp.array([0] * 8 + [1] * 8, dtype=jnp.int32)      # [N]

    params = init_params(k_p, num_node_features, num_classes)

    out = gcn_forward(x, edge_index, batch, params, num_graphs)
    out = jax.block_until_ready(out)
    assert out.shape == (num_graphs, num_classes)
    assert bool(jnp.all(jnp.isfinite(out)))
    print("KERNEL_OK")
</pallas_src>

<mosaic_0001>
module attributes {stable_mosaic.version = 11 : i64} {
  func.func @_xw_kernel(%arg0: i32, %arg1: memref<128x128xbf16, #tpu.memory_space<vmem>>, %arg2: memref<128x128xbf16, #tpu.memory_space<vmem>>, %arg3: memref<128x128xbf16, #tpu.memory_space<vmem>>) attributes {dimension_semantics = [#tpu.dimension_semantics<parallel>], iteration_bounds = array<i64: 1>, scalar_prefetch = 0 : i64, scratch_operands = 0 : i64, tpu.core_type = #tpu.core_type<tc>, window_params = [{transform_indices = @transform_0, window_bounds = array<i64: 128, 128>}, {pipeline_mode = #tpu.pipeline_mode<synchronous>, transform_indices = @transform_1, window_bounds = array<i64: 128, 128>}, {transform_indices = @transform_2, window_bounds = array<i64: 128, 128>}]} {
    %c0 = arith.constant 0 : index
    %c0_0 = arith.constant 0 : index
    %0 = vector.load %arg1[%c0, %c0_0] : memref<128x128xbf16, #tpu.memory_space<vmem>>, vector<128x128xbf16>
    %c0_1 = arith.constant 0 : index
    %c0_2 = arith.constant 0 : index
    %1 = vector.load %arg2[%c0_1, %c0_2] : memref<128x128xbf16, #tpu.memory_space<vmem>>, vector<128x128xbf16>
    %cst = arith.constant dense<0.000000e+00> : vector<128x128xf32>
    %2 = tpu.matmul %0, %1, %cst {dimension_numbers = #tpu.dot_dimension_numbers<[1], [0], [0], [1], [0, 0, 1, 1], [], []>} : vector<128x128xbf16>, vector<128x128xbf16>, vector<128x128xf32> -> vector<128x128xf32>
    %3 = arith.truncf %2 : vector<128x128xf32> to vector<128x128xbf16>
    %c0_3 = arith.constant 0 : index
    %c0_4 = arith.constant 0 : index
    %4 = vector.load %arg3[%c0_3, %c0_4] : memref<128x128xbf16, #tpu.memory_space<vmem>>, vector<128x128xbf16>
    tpu.vector_store %arg3[%c0_3, %c0_4], %3 {strides = array<i32>} : memref<128x128xbf16, #tpu.memory_space<vmem>>, vector<128x128xbf16>,
    return
  }
  func.func @transform_0(%arg0: i32) -> (i32, i32) {
    %c0_i32 = arith.constant 0 : i32
    %c0_i32_0 = arith.constant 0 : i32
    return %arg0, %c0_i32 : i32, i32
  }
  func.func @transform_1(%arg0: i32) -> (i32, i32) {
    %c0_i32 = arith.constant 0 : i32
    %c0_i32_0 = arith.constant 0 : i32
    %c0_i32_1 = arith.constant 0 : i32
    return %c0_i32, %c0_i32_0 : i32, i32
  }
  func.func @transform_2(%arg0: i32) -> (i32, i32) {
    %c0_i32 = arith.constant 0 : i32
    %c0_i32_0 = arith.constant 0 : i32
    return %arg0, %c0_i32 : i32, i32
  }
}

</mosaic_0001>

<bundles_post_ra>
// kernel: tpu_custom_call.1
= control target key start
LH: loop header
LB: loop body
LE: loop exit
PB: predicated region body
PF: predicated region fallthrough
CT: control target
= control target key end

     0   :  { %7 = vsyncpa [#allocation3], 0  ;;  %s648_s0 = inlined_call_operand.hbm [shape: bf16[128,128], index: 0, kind: input, shape index: {}]   ;;  %s649_s1 = inlined_call_operand.hbm [shape: bf16[128,128], index: 1, kind: input, shape index: {}]   ;;  %s650_s2 = inlined_call_operand.hbm [shape: bf16[128,128], index: 2, kind: output, shape index: {}]  }
   0x1   :  { %8 = vsyncpa [#allocation6], 0 }
   0x2   :  { %9 = vsyncpa [#allocation4], 0  ;;  %s610_s9 = smov [#allocation2]  }
   0x3   :  { %s15_s10 = sshll.u32 %s610_s9, 4  ;;  %s16_s10 = int_to_ptr.vmem [resolvable:$true] %s15_s10 }
   0x4   :  { %s552_s11 = scalar_lea.vmem %s16_s10, 1024  ;;  %p557_p1 = scmp.lt.s32.totalorder %s16_s10, %s16_s10 }
   0x5   :  { %p553_p0 = scmp.ne.s32.totalorder %s16_s10, %s552_s11  ;;  %p558_p2 = scmp.lt.s32.totalorder %s552_s11, %s552_s11 }
   0x7   :  { %p559_p3 = por %p558_p2, %p557_p1 }
   0x9   :  { %p560_p4 = pnand %p559_p3, %p553_p0 }
   0xb   :  { %563 = shalt.err (!%p560_p4)
}
   0xc   :  { %s611_s12 = smov 64   ;;  %s612_s13 = smov 4  }
   0xd   :  { %21 = dma.hbm_to_vmem [thread:$0]  %s648_s0, 1024, %s16_s10, [#allocation3], %s611_s12, %s611_s12, %s612_s13  }
   0xe   :  { %s613_s16 = smov [#allocation5]  }
   0xf   :  { %s27_s17 = sshll.u32 %s613_s16, 4  ;;  %s28_s17 = int_to_ptr.vmem [resolvable:$true] %s27_s17 }
  0x10   :  { %s572_s18 = scalar_lea.vmem %s28_s17, 1024  ;;  %p577_p6 = scmp.lt.s32.totalorder %s28_s17, %s28_s17 }
  0x11   :  { %p573_p5 = scmp.ne.s32.totalorder %s28_s17, %s572_s18  ;;  %p578_p7 = scmp.lt.s32.totalorder %s572_s18, %s572_s18 }
  0x13   :  { %p579_p8 = por %p578_p7, %p577_p6 }
  0x15   :  { %p580_p9 = pnand %p579_p8, %p573_p5 }
  0x17   :  { %583 = shalt.err (!%p580_p9)
}
  0x18   :  { %33 = dma.hbm_to_vmem [thread:$0]  %s649_s1, 1024, %s28_s17, [#allocation6], %s611_s12, %s611_s12, %s612_s13  }
  0x19   :  { %604 = dma.done.wait [#allocation3], 1024  }
  0x1a   :  { %605 = vsyncadd [#allocation3], 4294966272 }
  0x1b   :  { %606 = dma.done.wait [#allocation6], 1024  }
  0x1c   :  { %607 = vsyncadd [#allocation6], 4294966272  ;;  %v528_v0 = vld [vmem:[#allocation5 + $0x38] sm:$0xff]   ;;  %v529_v1 = vld [vmem:[#allocation5 + $0x30] sm:$0xff]   ;;  %s614_s0 = smov [#allocation7]  }
  0x1d   :  { %475 = vmatprep.subr.bf16.mxu0 %v528_v0  ;;  %507 = vmatprep.subr.bf16.mxu1 %v528_v0  ;;  %v530_v2 = vld [vmem:[#allocation5 + $0x28] sm:$0xff]   ;;  %v531_v3 = vld [vmem:[#allocation5 + $0x20] sm:$0xff]   ;;  %v532_v6 = vld [vmem:[#allocation5 + $0x18] sm:$0xff]   ;;  %s351_s1 = sshll.u32 %s614_s0, 4  ;;  %s352_s1 = int_to_ptr.vmem [resolvable:$true] %s351_s1 }
  0x1e   :  { %476 = vmatpush3.bf16.msra.mxu0 %v528_v0  ;;  %515 = vmatpush3.bf16.msra.mxu1 %v528_v0  ;;  %v536_v4 = vld [vmem:[#allocation2] sm:$0xff]   ;;  %v533_v7 = vld [vmem:[#allocation5 + $0x10] sm:$0xff]   ;;  %v534_v8 = vld [vmem:[#allocation5 + $0x8] sm:$0xff]   ;;  %s584_s21 = scalar_lea.vmem %s352_s1, 1024  ;;  %p589_p11 = scmp.lt.s32.totalorder %s352_s1, %s352_s1 }
  0x1f   :  { %477 = vmatprep.subr.bf16.mxu0 %v529_v1  ;;  %508 = vmatprep.subr.bf16.mxu1 %v529_v1  ;;  %v537_v5 = vld [vmem:[#allocation2 + $0x20] sm:$0xff]   ;;  %v538_v10 = vld [vmem:[#allocation2 + $0x8] sm:$0xff]   ;;  %v540_v12 = vld [vmem:[#allocation2 + $0x10] sm:$0xff]   ;;  %p585_p10 = scmp.ne.s32.totalorder %s352_s1, %s584_s21  ;;  %p590_p12 = scmp.lt.s32.totalorder %s584_s21, %s584_s21 }
  0x20   :  { %491 = vmatprep.mubr.bf16.mxu0 %v536_v4  ;;  %499 = vmatprep.mubr.bf16.mxu1 %v537_v5  ;;  %v535_v9 = vld [vmem:[#allocation5] sm:$0xff]   ;;  %v539_v11 = vld [vmem:[#allocation2 + $0x28] sm:$0xff]   ;;  %v541_v13 = vld [vmem:[#allocation2 + $0x30] sm:$0xff]  }
  0x21   :  { %v542_v14 = vld [vmem:[#allocation2 + $0x18] sm:$0xff]   ;;  %p591_p13 = por %p590_p12, %p589_p11 }
  0x22   :  { %478 = vmatpush3.bf16.msra.mxu0 %v529_v1  ;;  %516 = vmatpush3.bf16.msra.mxu1 %v529_v1  ;;  %v543_v15 = vld [vmem:[#allocation2 + $0x38] sm:$0xff]  }
  0x23   :  { %479 = vmatprep.subr.bf16.mxu0 %v530_v2  ;;  %509 = vmatprep.subr.bf16.mxu1 %v530_v2  ;;  %p592_p0 = pnand %p591_p13, %p585_p10 }
  0x26   :  { %480 = vmatpush3.bf16.msra.mxu0 %v530_v2  ;;  %517 = vmatpush3.bf16.msra.mxu1 %v530_v2 }
  0x27   :  { %481 = vmatprep.subr.bf16.mxu0 %v531_v3  ;;  %510 = vmatprep.subr.bf16.mxu1 %v531_v3 }
  0x2a   :  { %482 = vmatpush3.bf16.msra.mxu0 %v531_v3  ;;  %518 = vmatpush3.bf16.msra.mxu1 %v531_v3 }
  0x2b   :  { %483 = vmatprep.subr.bf16.mxu0 %v532_v6  ;;  %511 = vmatprep.subr.bf16.mxu1 %v532_v6 }
  0x2e   :  { %484 = vmatpush3.bf16.msra.mxu0 %v532_v6  ;;  %519 = vmatpush3.bf16.msra.mxu1 %v532_v6 }
  0x2f   :  { %485 = vmatprep.subr.bf16.mxu0 %v533_v7  ;;  %512 = vmatprep.subr.bf16.mxu1 %v533_v7 }
  0x32   :  { %486 = vmatpush3.bf16.msra.mxu0 %v533_v7  ;;  %520 = vmatpush3.bf16.msra.mxu1 %v533_v7 }
  0x33   :  { %487 = vmatprep.subr.bf16.mxu0 %v534_v8  ;;  %513 = vmatprep.subr.bf16.mxu1 %v534_v8 }
  0x36   :  { %488 = vmatpush3.bf16.msra.mxu0 %v534_v8  ;;  %521 = vmatpush3.bf16.msra.mxu1 %v534_v8 }
  0x37   :  { %489 = vmatprep.subr.bf16.mxu0 %v535_v9  ;;  %514 = vmatprep.subr.bf16.mxu1 %v535_v9 }
  0x3a   :  { %490 = vmatpush3.bf16.msra.mxu0 %v535_v9  ;;  %522 = vmatpush3.bf16.msra.mxu1 %v535_v9 }
  0x3d   :  { %492 = vmatmul.mubr.bf16.vlgmr.msra.gmra.mxu0 %v538_v10  ;;  %500 = vmatmul.mubr.bf16.vlgmr.msra.gmra.mxu1 %v539_v11 }
  0x3e   :  { %495 = vmatprep.mubr.bf16.mxu0 %v540_v12  ;;  %503 = vmatprep.mubr.bf16.mxu1 %v541_v13 }
  0x45   :  { %496 = vmatmul.mubr.bf16.gmra.mxu0 %v542_v14  ;;  %504 = vmatmul.mubr.bf16.gmra.mxu1 %v543_v15 }
  0xfd   :  { %v493_v16 = vpop.f32.mrf.mxu0  ;;  %v501_v17 = vpop.f32.mrf.mxu1 }
  0xff   :  { %v203_v18 = vpop.f32.mrf.mxu0  ;;  %v235_v19 = vpop.f32.mrf.mxu1 }
 0x101   :  { %v494_v20 = vpop.f32.mrf.mxu0  ;;  %v502_v21 = vpop.f32.mrf.mxu1 }
 0x102   :  { %v420_v22 = vpack.c.bf16 %v494_v20, %v493_v16  ;;  %v440_v23 = vpack.c.bf16 %v502_v21, %v501_v17 }
 0x103   :  { %v206_v24 = vpop.f32.mrf.mxu0  ;;  %v238_v25 = vpop.f32.mrf.mxu1 }
 0x104   :  { %452 = vst [vmem:[#allocation7 + $0x8] sm:$0xff] %v420_v22   ;;  %456 = vst [vmem:[#allocation7 + $0x28] sm:$0xff] %v440_v23   ;;  %v415_v26 = vpack.c.bf16 %v206_v24, %v203_v18  ;;  %v435_v27 = vpack.c.bf16 %v238_v25, %v235_v19 }
 0x105   :  { %v497_v28 = vpop.f32.mrf.mxu0  ;;  %v505_v29 = vpop.f32.mrf.mxu1 }
 0x106   :  { %416 = vst [vmem:[#allocation7] sm:$0xff] %v415_v26   ;;  %455 = vst [vmem:[#allocation7 + $0x20] sm:$0xff] %v435_v27  }
 0x107   :  { %v219_v30 = vpop.f32.mrf.mxu0  ;;  %v251_v31 = vpop.f32.mrf.mxu1 }
 0x109   :  { %v498_v32 = vpop.f32.mrf.mxu0  ;;  %v506_v33 = vpop.f32.mrf.mxu1 }
 0x10a   :  { %v430_v34 = vpack.c.bf16 %v498_v32, %v497_v28  ;;  %v450_v35 = vpack.c.bf16 %v506_v33, %v505_v29 }
 0x10b   :  { %v222_v36 = vpop.f32.mrf.mxu0  ;;  %v254_v37 = vpop.f32.mrf.mxu1 }
 0x10c   :  { %454 = vst [vmem:[#allocation7 + $0x18] sm:$0xff] %v430_v34   ;;  %458 = vst [vmem:[#allocation7 + $0x38] sm:$0xff] %v450_v35   ;;  %v425_v38 = vpack.c.bf16 %v222_v36, %v219_v30  ;;  %v445_v39 = vpack.c.bf16 %v254_v37, %v251_v31 }
 0x10e   :  { %453 = vst [vmem:[#allocation7 + $0x10] sm:$0xff] %v425_v38   ;;  %457 = vst [vmem:[#allocation7 + $0x30] sm:$0xff] %v445_v39  }
 0x10f   :  { %595 = shalt.err (!%p592_p0)
}
 0x110   :  { %357 = dma.vmem_to_hbm [thread:$0]  %s352_s1, 1024, %s650_s2, [#allocation4], %s611_s12, %s611_s12, %s612_s13  }
 0x111   :  { %608 = dma.done.wait [#allocation4], 1024  }
 0x112   :  { %609 = vsyncadd [#allocation4], 4294966272 }
 0x113   :  { %361 = vsyncpa [#allocation3], 1 }
 0x114   :  { %362 = vsyncpa [#allocation6], 1 }
 0x115   :  { %363 = vsyncpa [#allocation4], 1 }

</bundles_post_ra>
